<compile_context>
chip_gen: v6e
topology: v6e:2x2x1
jax: 0.10.0
libtpu: 0.0.40
codegen_flags: <defaults>
</compile_context>

<pallas_src>
import jax
import jax.numpy as jnp
from jax.experimental import pallas as pl
from jax.experimental.pallas import tpu as pltpu


def _mesh_loss_kernel(w_ref, pred_ref, fem_ref, out_ref, acc_ref):
    pid = pl.program_id(0)

    @pl.when(pid == 0)
    def _init():
        acc_ref[0] = jnp.float32(0.0)
        acc_ref[1] = jnp.float32(0.0)

    # In-kernel upcast: stream native dtype from HBM, do math in f32.
    p = pred_ref[...].astype(jnp.float32)
    f = fem_ref[...].astype(jnp.float32)
    _, x, y, z = p.shape  # static block shape

    # fem term: partial sum of squared error over this block of volumes.
    d = p - f
    fem_partial = jnp.sum(d * d)

    # regularization: forward differences restricted to the interior box
    # (x < X-1, y < Y-1, z < Z-1), matching the PyTorch triple loop.
    # The three squared diffs are fused into a single reduction.
    core = p[:, : x - 1, : y - 1, : z - 1]
    dx = p[:, 1:, : y - 1, : z - 1] - core
    dy = p[:, : x - 1, 1:, : z - 1] - core
    dz = p[:, : x - 1, : y - 1, 1:] - core
    reg_partial = jnp.sum(dx * dx + dy * dy + dz * dz)

    acc_ref[0] += fem_partial
    acc_ref[1] += reg_partial

    @pl.when(pid == pl.num_programs(0) - 1)
    def _finalize():
        # weights already carry the 1/(N*X*Y*Z) and 1/N normalizations.
        out_ref[0, 0] = acc_ref[0] * w_ref[0] + acc_ref[1] * w_ref[1]


# Budget so that (2 inputs x 2 pipeline buffers x block) + in-kernel f32
# temporaries stay comfortably below the scoped-VMEM limit on all generations
# (v5e default 16 MiB, v6e/v7x 32 MiB; v7x physical VMEM is only 64 MiB).
_BLOCK_F32_BYTES_BUDGET = 2 * 1024 * 1024
_VMEM_LIMIT_BYTES = 32 * 1024 * 1024


def _pick_n_blk(n, vol_f32_bytes):
    """Largest divisor of n whose block fits the per-block byte budget."""
    best = 1
    for div in range(1, n + 1):
        if n % div == 0 and div * vol_f32_bytes <= _BLOCK_F32_BYTES_BUDGET:
            best = div
    return best


def mesh_loss(pred, pc, fem_mesh, fem_weight, reg_weight, *, n_blk=None):
    # `pc` is unused by the reference forward pass (ChamferDistance is
    # constructed but never invoked); kept only for signature parity.
    del pc
    b, c, x, y, z = pred.shape
    n = b * c
    p = pred.reshape(n, x, y, z)
    f = fem_mesh.reshape(n, x, y, z)

    vol_f32_bytes = x * y * z * 4
    if n_blk is None:
        n_blk = _pick_n_blk(n, vol_f32_bytes)
    assert n % n_blk == 0, "n_blk must divide B*C"
    grid = (n // n_blk,)

    # Fold the mean normalizations into the weights -> kernel epilogue is a
    # 2-term dot product over the SMEM accumulators.
    w = jnp.array(
        [fem_weight / float(n * x * y * z), reg_weight / float(n)],
        dtype=jnp.float32,
    )

    itemsize = jnp.dtype(p.dtype).itemsize
    cost = pl.CostEstimate(
        flops=12 * n * x * y * z,
        transcendentals=0,
        bytes_accessed=2 * n * x * y * z * itemsize + 16,
    )

    out = pl.pallas_call(
        _mesh_loss_kernel,
        out_shape=jax.ShapeDtypeStruct((1, 1), jnp.float32),
        grid=grid,
        in_specs=[
            pl.BlockSpec(memory_space=pltpu.MemorySpace.SMEM),       # weights
            pl.BlockSpec((n_blk, x, y, z), lambda i: (i, 0, 0, 0)),  # pred
            pl.BlockSpec((n_blk, x, y, z), lambda i: (i, 0, 0, 0)),  # fem_mesh
        ],
        out_specs=pl.BlockSpec(memory_space=pltpu.MemorySpace.SMEM),
        scratch_shapes=[pltpu.SMEM((2,), jnp.float32)],
        compiler_params=pltpu.CompilerParams(
            dimension_semantics=("arbitrary",),
            vmem_limit_bytes=_VMEM_LIMIT_BYTES,
        ),
        cost_estimate=cost,
    )(w, p, f)
    return out[0, 0]


def _reference(pred, fem_mesh, fem_weight, reg_weight):
    # Pure-JAX mirror of the PyTorch module for a correctness check.
    b, c, x, y, z = pred.shape
    fem_loss = jnp.mean((pred - fem_mesh) ** 2)
    core = pred[:, :, : x - 1, : y - 1, : z - 1]
    dx = pred[:, :, 1:, : y - 1, : z - 1] - core
    dy = pred[:, :, : x - 1, 1:, : z - 1] - core
    dz = pred[:, :, : x - 1, : y - 1, 1:] - core
    reg = (jnp.sum(dx ** 2) + jnp.sum(dy ** 2) + jnp.sum(dz ** 2)) / (b * c)
    return fem_loss * fem_weight + reg * reg_weight


if __name__ == "__main__":
    key = jax.random.PRNGKey(0)
    k1, k2, k3 = jax.random.split(key, 3)
    B, C, X, Y, Z = 2, 3, 6, 6, 6
    pred = jax.random.normal(k1, (B, C, X, Y, Z), dtype=jnp.float32)
    fem_mesh = jax.random.normal(k2, (B, C, X, Y, Z), dtype=jnp.float32)
    pc = jax.random.normal(k3, (B, 128, 3), dtype=jnp.float32)  # unused by forward
    fem_weight, reg_weight = 1.0, 0.1

    ref = _reference(pred, fem_mesh, fem_weight, reg_weight)

    # n_blk=2 -> 3-step grid: exercises the cross-step SMEM accumulation path.
    loss = jax.block_until_ready(
        mesh_loss(pred, pc, fem_mesh, fem_weight, reg_weight, n_blk=2))
    assert jnp.allclose(loss, ref, rtol=1e-5, atol=1e-5), (loss, ref)

    # auto block-size path (single grid step for this toy size).
    loss2 = jax.block_until_ready(
        mesh_loss(pred, pc, fem_mesh, fem_weight, reg_weight))
    assert jnp.allclose(loss2, ref, rtol=1e-5, atol=1e-5), (loss2, ref)

    print("KERNEL_OK")
</pallas_src>

<mosaic_0001>
module attributes {stable_mosaic.version = 11 : i64} {
  func.func @_mesh_loss_kernel(%arg0: i32, %arg1: memref<2xf32, #tpu.memory_space<smem>>, %arg2: memref<2x6x6x6xf32, #tpu.memory_space<vmem>>, %arg3: memref<2x6x6x6xf32, #tpu.memory_space<vmem>>, %arg4: memref<1x1xf32, #tpu.memory_space<smem>>, %arg5: memref<2xf32, #tpu.memory_space<smem>>) attributes {dimension_semantics = [#tpu.dimension_semantics<arbitrary>], iteration_bounds = array<i64: 3>, scalar_prefetch = 0 : i64, scratch_operands = 1 : i64, tpu.core_type = #tpu.core_type<tc>, window_params = [{transform_indices = @transform_0, window_bounds = array<i64: 2>}, {transform_indices = @transform_1, window_bounds = array<i64: 2, 6, 6, 6>}, {transform_indices = @transform_2, window_bounds = array<i64: 2, 6, 6, 6>}, {transform_indices = @transform_3, window_bounds = array<i64: 1, 1>}]} {
    %c0_i32 = arith.constant 0 : i32
    %0 = arith.cmpi eq, %arg0, %c0_i32 : i32
    %1 = arith.extui %0 : i1 to i32
    %c0_i32_0 = arith.constant 0 : i32
    %2 = arith.cmpi ne, %1, %c0_i32_0 : i32
    scf.if %2 {
      %cst_13 = arith.constant 0.000000e+00 : f32
      %c0_14 = arith.constant 0 : index
      %36 = memref.load %arg5[%c0_14] : memref<2xf32, #tpu.memory_space<smem>>
      memref.store %cst_13, %arg5[%c0_14] : memref<2xf32, #tpu.memory_space<smem>>
      %cst_15 = arith.constant 0.000000e+00 : f32
      %c1_16 = arith.constant 1 : index
      %37 = memref.load %arg5[%c1_16] : memref<2xf32, #tpu.memory_space<smem>>
      memref.store %cst_15, %arg5[%c1_16] : memref<2xf32, #tpu.memory_space<smem>>
    } else {
    }
    %c0 = arith.constant 0 : index
    %c0_1 = arith.constant 0 : index
    %c0_2 = arith.constant 0 : index
    %c0_3 = arith.constant 0 : index
    %3 = vector.load %arg2[%c0, %c0_1, %c0_2, %c0_3] : memref<2x6x6x6xf32, #tpu.memory_space<vmem>>, vector<2x6x6x6xf32>
    %c0_4 = arith.constant 0 : index
    %c0_5 = arith.constant 0 : index
    %c0_6 = arith.constant 0 : index
    %c0_7 = arith.constant 0 : index
    %4 = vector.load %arg3[%c0_4, %c0_5, %c0_6, %c0_7] : memref<2x6x6x6xf32, #tpu.memory_space<vmem>>, vector<2x6x6x6xf32>
    %5 = arith.subf %3, %4 : vector<2x6x6x6xf32>
    %6 = arith.mulf %5, %5 : vector<2x6x6x6xf32>
    %7 = vector.shape_cast %6 : vector<2x6x6x6xf32> to vector<1x2x6x6x6xf32>
    %cst = arith.constant dense<0.000000e+00> : vector<1xf32>
    %8 = vector.multi_reduction <add>, %7, %cst [1, 2, 3, 4] : vector<1x2x6x6x6xf32> to vector<1xf32>
    %9 = vector.shape_cast %8 : vector<1xf32> to vector<1x1x1x1x1xf32>
    %10 = vector.extract %9[0, 0, 0, 0, 0] : f32 from vector<1x1x1x1x1xf32>
    %11 = vector.extract_strided_slice %3 {offsets = [0, 0, 0, 0], sizes = [2, 5, 5, 5], strides = [1, 1, 1, 1]} : vector<2x6x6x6xf32> to vector<2x5x5x5xf32>
    %12 = vector.extract_strided_slice %3 {offsets = [0, 1, 0, 0], sizes = [2, 5, 5, 5], strides = [1, 1, 1, 1]} : vector<2x6x6x6xf32> to vector<2x5x5x5xf32>
    %13 = arith.subf %12, %11 : vector<2x5x5x5xf32>
    %14 = vector.extract_strided_slice %3 {offsets = [0, 0, 1, 0], sizes = [2, 5, 5, 5], strides = [1, 1, 1, 1]} : vector<2x6x6x6xf32> to vector<2x5x5x5xf32>
    %15 = arith.subf %14, %11 : vector<2x5x5x5xf32>
    %16 = vector.extract_strided_slice %3 {offsets = [0, 0, 0, 1], sizes = [2, 5, 5, 5], strides = [1, 1, 1, 1]} : vector<2x6x6x6xf32> to vector<2x5x5x5xf32>
    %17 = arith.subf %16, %11 : vector<2x5x5x5xf32>
    %18 = arith.mulf %13, %13 : vector<2x5x5x5xf32>
    %19 = arith.mulf %15, %15 : vector<2x5x5x5xf32>
    %20 = arith.addf %18, %19 : vector<2x5x5x5xf32>
    %21 = arith.mulf %17, %17 : vector<2x5x5x5xf32>
    %22 = arith.addf %20, %21 : vector<2x5x5x5xf32>
    %23 = vector.shape_cast %22 : vector<2x5x5x5xf32> to vector<1x2x5x5x5xf32>
    %cst_8 = arith.constant dense<0.000000e+00> : vector<1xf32>
    %24 = vector.multi_reduction <add>, %23, %cst_8 [1, 2, 3, 4] : vector<1x2x5x5x5xf32> to vector<1xf32>
    %25 = vector.shape_cast %24 : vector<1xf32> to vector<1x1x1x1x1xf32>
    %26 = vector.extract %25[0, 0, 0, 0, 0] : f32 from vector<1x1x1x1x1xf32>
    %c0_9 = arith.constant 0 : index
    %27 = memref.load %arg5[%c0_9] : memref<2xf32, #tpu.memory_space<smem>>
    %28 = arith.addf %27, %10 : f32
    %c0_10 = arith.constant 0 : index
    %29 = memref.load %arg5[%c0_10] : memref<2xf32, #tpu.memory_space<smem>>
    memref.store %28, %arg5[%c0_10] : memref<2xf32, #tpu.memory_space<smem>>
    %c1 = arith.constant 1 : index
    %30 = memref.load %arg5[%c1] : memref<2xf32, #tpu.memory_space<smem>>
    %31 = arith.addf %30, %26 : f32
    %c1_11 = arith.constant 1 : index
    %32 = memref.load %arg5[%c1_11] : memref<2xf32, #tpu.memory_space<smem>>
    memref.store %31, %arg5[%c1_11] : memref<2xf32, #tpu.memory_space<smem>>
    %c2_i32 = arith.constant 2 : i32
    %33 = arith.cmpi eq, %arg0, %c2_i32 : i32
    %34 = arith.extui %33 : i1 to i32
    %c0_i32_12 = arith.constant 0 : i32
    %35 = arith.cmpi ne, %34, %c0_i32_12 : i32
    scf.if %35 {
      %c0_13 = arith.constant 0 : index
      %36 = memref.load %arg5[%c0_13] : memref<2xf32, #tpu.memory_space<smem>>
      %c0_14 = arith.constant 0 : index
      %37 = memref.load %arg1[%c0_14] : memref<2xf32, #tpu.memory_space<smem>>
      %38 = arith.mulf %36, %37 : f32
      %c1_15 = arith.constant 1 : index
      %39 = memref.load %arg5[%c1_15] : memref<2xf32, #tpu.memory_space<smem>>
      %c1_16 = arith.constant 1 : index
      %40 = memref.load %arg1[%c1_16] : memref<2xf32, #tpu.memory_space<smem>>
      %41 = arith.mulf %39, %40 : f32
      %42 = arith.addf %38, %41 : f32
      %c0_17 = arith.constant 0 : index
      %c0_18 = arith.constant 0 : index
      %43 = memref.load %arg4[%c0_17, %c0_18] : memref<1x1xf32, #tpu.memory_space<smem>>
      memref.store %42, %arg4[%c0_17, %c0_18] : memref<1x1xf32, #tpu.memory_space<smem>>
    } else {
    }
    return
  }
  func.func @transform_0(%arg0: i32) -> i32 {
    %c0_i32 = arith.constant 0 : i32
    %c0_i32_0 = arith.constant 0 : i32
    return %c0_i32 : i32
  }
  func.func @transform_1(%arg0: i32) -> (i32, i32, i32, i32) {
    %c0_i32 = arith.constant 0 : i32
    %c0_i32_0 = arith.constant 0 : i32
    %c0_i32_1 = arith.constant 0 : i32
    %c0_i32_2 = arith.constant 0 : i32
    return %arg0, %c0_i32, %c0_i32_0, %c0_i32_1 : i32, i32, i32, i32
  }
  func.func @transform_2(%arg0: i32) -> (i32, i32, i32, i32) {
    %c0_i32 = arith.constant 0 : i32
    %c0_i32_0 = arith.constant 0 : i32
    %c0_i32_1 = arith.constant 0 : i32
    %c0_i32_2 = arith.constant 0 : i32
    return %arg0, %c0_i32, %c0_i32_0, %c0_i32_1 : i32, i32, i32, i32
  }
  func.func @transform_3(%arg0: i32) -> (i32, i32) {
    %c0_i32 = arith.constant 0 : i32
    %c0_i32_0 = arith.constant 0 : i32
    %c0_i32_1 = arith.constant 0 : i32
    return %c0_i32, %c0_i32_0 : i32, i32
  }
}

</mosaic_0001>

<bundles_post_ra>
// kernel: tpu_custom_call.1
= control target key start
LH: loop header
LB: loop body
LE: loop exit
PB: predicated region body
PF: predicated region fallthrough
CT: control target
= control target key end

     0   :  { %8 = vsyncpa [#allocation5], 0  ;;  %s1269_s0 = inlined_call_operand.hbm [shape: f32[2], index: 0, kind: input, shape index: {}]   ;;  %s1270_s1 = inlined_call_operand.hbm [shape: f32[6,6,6,6], index: 1, kind: input, shape index: {}]   ;;  %s1271_s2 = inlined_call_operand.hbm [shape: f32[6,6,6,6], index: 2, kind: input, shape index: {}]   ;;  %s1272_s3 = inlined_call_operand.hbm [shape: f32[1,1], index: 3, kind: output, shape index: {}]  }
   0x1   :  { %9 = vsyncpa [#allocation4], 0 }
   0x2   :  { %11 = vsyncpa [#allocation4 + $0x1], 0 }
   0x3   :  { %12 = vsyncpa [#allocation9], 0 }
   0x4   :  { %14 = vsyncpa [#allocation9 + $0x1], 0 }
   0x5   :  { %15 = vsyncpa [#allocation6], 0  ;;  %s931_s12 = smov 0   ;;  %s933_s13 = smov 0  }
   0x6   :  { %s935_s14 = smov 0   ;;  %s937_s15 = smov 0  }
   0x7 LB: > { %s673_s16 = sadd.s32 4294967295, %s900_s15   ;;  %s951_s17 = sadd.s32 1, %s900_s15   ;;  %s900_s15 = sphi %s937_s15, %s1285_s15   ;;  %s896_s14 = sphi %s935_s14, %s1284_s14   ;;  %s892_s13 = sphi %s933_s13, %s1283_s13   ;;  %s888_s12 = sphi %s931_s12, %s1282_s12  }
   0x8   : > { %s46_s18 = ssub.s32 %s900_s15, %s951_s17  ;;  %s49_s19 = sadd.s32 1, %s896_s14 }
   0x9   : > { %p47_p0 = scmp.eq.s32.totalorder %s46_s18, 0  ;;  %p56_p1 = scmp.ne.s32.totalorder %s896_s14, %s892_s13 }
   0xa   : > { %p57_p2 = scmp.eq.s32.totalorder %s900_s15, 0  ;;  %p62_p3 = scmp.ne.s32.totalorder %s892_s13, %s888_s12 }
   0xb   : > { %s961_s20 = scalar_select %p47_p0, %s896_s14, %s49_s19  }
   0xc   : > { %p58_p4 = por %p57_p2, %p56_p1  ;;  %p965_p5 = scmp.eq.s32.totalorder %s673_s16, 0 }
   0xd   : > { %p674_p6 = scmp.ge.s32.totalorder %s900_s15, 1  ;;  %p120_p7 = scmp.lt.s32.totalorder %s900_s15, 4 }
   0xe   : > { %s1276_s21 = scalar_select %p965_p5, 1, 0 }
   0xf   : > { %p973_p8 = por %p965_p5, %p62_p3  ;;  %p977_p9 = pnand %p674_p6, %p120_p7 }
  0x10   : > { %p732_p10 = scmp.lt.s32.totalorder %s900_s15, 3  ;;  %s985_s24 = sand.u32 1, %s896_s14  }
  0x11   : > { %s1277_s22 = scalar_select %p973_p8, 1, 0 }
  0x12   : > { %p720_p11 = pneg %p977_p9  ;;  %p987_p12 = pnand %p732_p10, %p58_p4 }
  0x13   : > { %s694_s26 = smul.u32 96, %s985_s24  ;;  %s902_s28 = smov [#allocation3]  }
  0x14   : > { %p721_p13 = pnand %p720_p11, %p965_p5  ;;  %s695_s27 = smul.u32 1536, %s900_s15 }
  0x15   : > { %s146_s7 = scalar_lea.vmem [#allocation7], %s694_s26  ;;  %s143_s9 = scalar_lea.sflag [#allocation4], %s985_s24 }
  0x16   : > { %723 = dma.hbm_to_smem (!%p721_p13), %s1269_s0, 16, %s902_s28, [#allocation5]  }
  0x17   : > { %s1003_s6 = scalar_lea.hbm %s1270_s1, %s695_s27  ;;  %s154_s8 = sshll.u32 %s146_s7, 4  ;;  %s1007_s8 = int_to_ptr.vmem [resolvable:$true] %s154_s8 }
  0x18   : > { %s788_s10 = scalar_lea.hbm %s1003_s6, 1536  ;;  %p790_p1 = pneg %p987_p12 }
  0x19   : > { %p789_p0 = scmp.ne.s32.totalorder %s1003_s6, %s788_s10  ;;  %s793_s18 = scalar_lea.hbm %s1270_s1, 4608 }
  0x1a   : > { %p794_p4 = scmp.lt.s32.totalorder %s1003_s6, %s1270_s1  ;;  %p795_p6 = scmp.lt.s32.totalorder %s793_s18, %s788_s10 }
  0x1b   : > { %p791_p2 = pnand %p790_p1, %p789_p0 }
  0x1c   : > { %p796_p7 = por %p795_p6, %p794_p4 }
  0x1d   : > { %p792_p3 = pneg %p791_p2 }
  0x1f   : > { %p797_p10 = pnand %p796_p7, %p792_p3 }
  0x21   : > { %800 = shalt.err (!%p797_p10)
}
  0x22   : > { %s801_s29 = scalar_lea.vmem %s1007_s8, 1536  ;;  %s903_s30 = smov [#allocation7]  }
  0x23   : > { %p802_p11 = scmp.ne.s32.totalorder %s1007_s8, %s801_s29  ;;  %s806_s4 = sshll.u32 %s903_s30, 4  ;;  %s807_s4 = int_to_ptr.vmem [resolvable:$false] %s806_s4 }
  0x24   : > { %s808_s5 = scalar_lea.vmem %s807_s4, 3072  ;;  %p809_p2 = scmp.lt.s32.totalorder %s1007_s8, %s807_s4 }
  0x25   : > { %p804_p13 = pnand %p802_p11, %p790_p1  ;;  %p810_p8 = scmp.lt.s32.totalorder %s808_s5, %s801_s29 }
  0x27   : > { %p805_p0 = pneg %p804_p13  ;;  %p811_p5 = por %p810_p8, %p809_p2 }
  0x29   : > { %p812_p4 = pnand %p811_p5, %p805_p0 }
  0x2b   : > { %815 = shalt.err (!%p812_p4)
}
  0x2c   : > { %s904_s7 = smov 128   ;;  %s905_s10 = smov 8  }
  0x2d   : > { %727 = dma.hbm_to_vmem [thread:$0]  (!%p987_p12), %s1003_s6, 1536, %s1007_s8, %s143_s9, %s904_s7, %s904_s7, %s905_s10  }
  0x2e   : > { %s1044_s18 = scalar_lea.hbm %s1271_s2, %s695_s27  ;;  %s168_s19 = scalar_lea.vmem [#allocation8], %s694_s26 }
  0x2f   : > { %s176_s28 = sshll.u32 %s168_s19, 4  ;;  %s165_s29 = scalar_lea.sflag [#allocation9], %s985_s24  ;;  %s1048_s28 = int_to_ptr.vmem [resolvable:$true] %s176_s28 }
  0x30   : > { %s816_s30 = scalar_lea.hbm %s1044_s18, 1536  ;;  %s821_s27 = scalar_lea.hbm %s1271_s2, 4608 }
  0x31   : > { %p817_p5 = scmp.ne.s32.totalorder %s1044_s18, %s816_s30  ;;  %p822_p6 = scmp.lt.s32.totalorder %s1044_s18, %s1271_s2 }
  0x32   : > { %p823_p7 = scmp.lt.s32.totalorder %s821_s27, %s816_s30 }
  0x33   : > { %p819_p8 = pnand %p817_p5, %p790_p1 }
  0x34   : > { %p824_p10 = por %p823_p7, %p822_p6 }
  0x35   : > { %p820_p3 = pneg %p819_p8 }
  0x37   : > { %p825_p11 = pnand %p824_p10, %p820_p3 }
  0x39   : > { %828 = shalt.err (!%p825_p11)
}
  0x3a   : > { %s829_s24 = scalar_lea.vmem %s1048_s28, 1536  ;;  %s906_s26 = smov [#allocation8]  }
  0x3b   : > { %p830_p13 = scmp.ne.s32.totalorder %s1048_s28, %s829_s24  ;;  %s834_s5 = sshll.u32 %s906_s26, 4  ;;  %s835_s5 = int_to_ptr.vmem [resolvable:$false] %s834_s5 }
  0x3c   : > { %s836_s11 = scalar_lea.vmem %s835_s5, 3072  ;;  %p837_p4 = scmp.lt.s32.totalorder %s1048_s28, %s835_s5 }
  0x3d   : > { %p832_p0 = pnand %p830_p13, %p790_p1  ;;  %p838_p5 = scmp.lt.s32.totalorder %s836_s11, %s829_s24 }
  0x3f   : > { %p833_p2 = pneg %p832_p0  ;;  %p839_p8 = por %p838_p5, %p837_p4 }
  0x41   : > { %p840_p6 = pnand %p839_p8, %p833_p2 }
  0x43   : > { %843 = shalt.err (!%p840_p6)
}
  0x44   : > { %730 = dma.hbm_to_vmem [thread:$0]  (!%p987_p12), %s1044_s18, 1536, %s1048_s28, %s165_s29, %s904_s7, %s904_s7, %s905_s10  }
  0x45   : > { %188 = sbr.rel (%p977_p9) target bundleno = 555 (0x22b), region = 32  ;;  %p1280_p1 = scmp.ne.s32.totalorder (!%p977_p9), %s1276_s21, 0 }
  0x4a   : > { %871 = dma.done.wait (%p1280_p1), [#allocation5], 16  }
  0x4b   : > { %873 = vsyncadd (%p1280_p1), [#allocation5], 4294967280  ;;  %s194_s12 = sand.u32 1, %s892_s13   ;;  %p1281_p3 = scmp.ne.s32.totalorder %s1277_s22, 0 }
  0x4c   : > { %s698_s19 = smul.u32 96, %s194_s12  ;;  %s195_s25 = scalar_lea.sflag [#allocation4], %s194_s12 }
  0x4e   : > { %s1083_s30 = scalar_lea.vmem [#allocation7], %s698_s19 }
  0x4f   : > { %875 = dma.done.wait (%p1281_p3), %s195_s25, 1536  }
  0x50   : > { %877 = vsyncadd (%p1281_p3), %s195_s25, 4294965760  ;;  %s204_s23 = scalar_lea.sflag [#allocation9], %s194_s12  ;;  %s1089_s7 = scalar_lea.vmem [#allocation8], %s698_s19 }
  0x51   : > { %879 = dma.done.wait (%p1281_p3), %s204_s23, 1536  }
  0x52   : > { %881 = vsyncadd (%p1281_p3), %s204_s23, 4294965760 }
  0x53   : > { %212 = sfence }
  0x54   : > { %v1096_v0 = vld [vmem:[%s1083_s30] sm:$0x3f]  ;;  %s907_s10 = smov 1   ;;  %v1100_v1 = vld [vmem:[%s1083_s30 + $0x10] sm:$0x3f]  ;;  %vm289_vm0 = vcmask 46080  }
  0x55   : > { %372 = vrot.lane.b32.xlu0 %v1096_v0, %s907_s10  ;;  %376 = vrot.lane.b32.xlu1 %v1100_v1, %s907_s10  ;;  %v1104_v2 = vld [vmem:[%s1083_s30 + $0x8] sm:$0x3f]  ;;  %v1107_v3 = vld [vmem:[%s1083_s30 + $0x18] sm:$0x3f]  ;;  %s908_s22 = smov 127   ;;  %vm532_vm1 = vcmask 36864  }
  0x56   : > { %v1112_v4 = vld [vmem:[%s1083_s30 + $0x20] sm:$0x3f]  ;;  %v1115_v5 = vld [vmem:[%s1083_s30 + $0x30] sm:$0x3f]  ;;  %v1120_v6 = vld [vmem:[%s1083_s30 + $0x38] sm:$0x3f] }
  0x57   : > { %v1123_v7 = vld [vmem:[%s1083_s30 + $0x40] sm:$0x3f]  ;;  %v1128_v8 = vld [vmem:[%s1083_s30 + $0x48] sm:$0x3f]  ;;  %v1131_v9 = vld [vmem:[%s1083_s30 + $0x50] sm:$0x3f] }
  0x58   : > { %v253_v10 = vld [vmem:[%s1089_s7] sm:$0x3f]  ;;  %v254_v11 = vld [vmem:[%s1089_s7 + $0x8] sm:$0x3f]  ;;  %v255_v13 = vld [vmem:[%s1089_s7 + $0x10] sm:$0x3f] }
  0x59   : > { %374 = vrot.lane.b32.xlu0 %v1104_v2, %s907_s10  ;;  %378 = vrot.lane.b32.xlu1 %v1107_v3, %s907_s10  ;;  %v265_v12 = vsub.f32 %v1096_v0, %v253_v10  ;;  %v266_v14 = vsub.f32 %v1104_v2, %v254_v11  ;;  %v267_v16 = vsub.f32 %v1100_v1, %v255_v13  ;;  %v256_v20 = vld [vmem:[%s1089_s7 + $0x18] sm:$0x3f]  ;;  %v257_v30 = vld [vmem:[%s1089_s7 + $0x20] sm:$0x3f]  ;;  %s909_s18 = smov 0.0   ;;  %s574_s8 = sld [smem:[#allocation3]] }
  0x5a   : > { %v268_v25 = vsub.f32 %v1107_v3, %v256_v20  ;;  %v269_v36 = vsub.f32 %v1112_v4, %v257_v30  ;;  %v1156_v41 = vld [vmem:[%s1083_s30 + $0x28] sm:$0x3f]  ;;  %v259_v56 = vld [vmem:[%s1089_s7 + $0x30] sm:$0x3f]  ;;  %v260_v13 = vld [vmem:[%s1089_s7 + $0x38] sm:$0x3f] }
  0x5b   : > { %v277_v17 = vmul.f32 %v265_v12, %v265_v12  ;;  %v278_v21 = vmul.f32 %v266_v14, %v266_v14  ;;  %v279_v26 = vmul.f32 %v267_v16, %v267_v16  ;;  %v258_v42 = vld [vmem:[%s1089_s7 + $0x28] sm:$0x3f]  ;;  %v271_v11 = vsub.f32 %v1115_v5, %v259_v56  ;;  %v261_v20 = vld [vmem:[%s1089_s7 + $0x40] sm:$0x3f]  ;;  %v263_v30 = vld [vmem:[%s1089_s7 + $0x50] sm:$0x3f] }
  0x5c   : > { %v280_v43 = vmul.f32 %v268_v25, %v268_v25  ;;  %v270_v48 = vsub.f32 %v1156_v41, %v258_v42  ;;  %v281_v53 = vmul.f32 %v269_v36, %v269_v36  ;;  %v262_v25 = vld [vmem:[%s1089_s7 + $0x48] sm:$0x3f]  ;;  %v264_v36 = vld [vmem:[%s1089_s7 + $0x58] sm:$0x3f]  ;;  %v322_v56 = vsub.f32 %v1104_v2, %v1096_v0  ;;  %712 = sst [smem:[#allocation2]] (%p1280_p1), %s909_s18  ;;  %p735_p9 = scmp.eq.s32.totalorder %s673_s16, 2 }
  0x5d   : > { %380 = vrot.lane.b32.xlu0 %v1112_v4, %s907_s10  ;;  %382 = vrot.lane.b32.xlu1 %v1115_v5, %s907_s10  ;;  %v291_v31 = vsel %vm289_vm0, %v278_v21, 0.0  ;;  %v290_v32 = vsel %vm289_vm0, %v277_v17, 0.0  ;;  %v293_v44 = vsel %vm289_vm0, %v279_v26, 0.0  ;;  %713 = sst [smem:[#allocation2 + $0x1]] (%p1280_p1), %s909_s18  ;;  %s910_s11 = smov [#allocation10]  }
  0x5e   : > { %v292_v37 = vadd.f32 %v291_v31, %v290_v32  ;;  %v295_v54 = vsel %vm289_vm0, %v280_v43, 0.0  ;;  %v282_v59 = vmul.f32 %v270_v48, %v270_v48  ;;  %v297_v10 = vsel %vm289_vm0, %v281_v53, 0.0  ;;  %s561_s28 = sld [smem:[#allocation2]] }
  0x5f   : > { %v275_v32 = vsub.f32 %v1131_v9, %v263_v30  ;;  %v342_v48 = vrot.slane %v1096_v0, 7  ;;  %v345_v53 = vrot.slane %v1107_v3, 7  ;;  %s686_s21 = sld [smem:[#allocation2 + $0x1]] }
  0x60   : > { %v294_v49 = vadd.f32 %v293_v44, %v292_v37  ;;  %v299_v17 = vsel %vm289_vm0, %v282_v59, 0.0  ;;  %v323_v59 = vsub.f32 %v1100_v1, %v1104_v2  ;;  %s689_s27 = sld [smem:[#allocation3 + $0x1]] }
  0x61   : > { %384 = vrot.lane.b32.xlu0 %v1120_v6, %s907_s10  ;;  %386 = vrot.lane.b32.xlu1 %v1123_v7, %s907_s10 }
  0x62   : > { %v296_v60 = vadd.f32 %v295_v54, %v294_v49  ;;  %v343_v49 = vrot.slane %v1104_v2, 7 }
  0x65   : > { %388 = vrot.lane.b32.xlu0 %v1128_v8, %s907_s10  ;;  %390 = vrot.lane.b32.xlu1 %v1131_v9, %s907_s10 }
  0xc7   : > { %v373_v15 = vpop.permute.xlu0 %372  ;;  %v377_v19 = vpop.permute.xlu1 %376 }
  0xc8   : > { %v402_v18 = vsub.f32 %v1096_v0, %v373_v15  ;;  %v404_v22 = vsub.f32 %v1100_v1, %v377_v19  ;;  %v298_v15 = vadd.f32 %v297_v10, %v296_v60  ;;  %v283_v19 = vmul.f32 %v271_v11, %v271_v11 }
  0xc9   : > { %v348_v60 = vrot.slane %v1120_v6, 7 }
  0xca   : > { %v472_v23 = vmul.f32 %v402_v18, %v402_v18  ;;  %v474_v27 = vmul.f32 %v404_v22, %v404_v22  ;;  %v272_v18 = vsub.f32 %v1120_v6, %v260_v13  ;;  %v300_v21 = vadd.f32 %v299_v17, %v298_v15 }
  0xcb   : > { %v375_v24 = vpop.permute.xlu0 %374  ;;  %v379_v29 = vpop.permute.xlu1 %378  ;;  %v273_v22 = vsub.f32 %v1123_v7, %v261_v20  ;;  %v368_v15 = vsub.f32 %v1120_v6, %v348_v60  ;;  %v326_v20 = vsub.f32 %v1156_v41, %v1112_v4 }
  0xcc   : > { %v403_v28 = vsub.f32 %v1104_v2, %v375_v24  ;;  %492 = vrot.lane.b32.xlu0 %v472_v23, %s908_s22  ;;  %v405_v33 = vsub.f32 %v1107_v3, %v379_v29  ;;  %v284_v23 = vmul.f32 %v272_v18, %v272_v18  ;;  %v301_v24 = vsel %vm289_vm0, %v283_v19, 0.0 }
  0xcd   : > { %v302_v26 = vadd.f32 %v301_v24, %v300_v21  ;;  %v325_v18 = vsub.f32 %v1112_v4, %v1107_v3 }
  0xce   : > { %v473_v34 = vmul.f32 %v403_v28, %v403_v28  ;;  %v475_v38 = vmul.f32 %v405_v33, %v405_v33  ;;  %v285_v28 = vmul.f32 %v273_v22, %v273_v22  ;;  %v303_v29 = vsel %vm289_vm0, %v284_v23, 0.0 }
  0xcf   : > { %v381_v35 = vpop.permute.xlu0 %380  ;;  %v383_v40 = vpop.permute.xlu1 %382  ;;  %v304_v31 = vadd.f32 %v303_v29, %v302_v26  ;;  %v350_v22 = vrot.slane %v1128_v8, 7  ;;  %v327_v23 = vsub.f32 %v1120_v6, %v1115_v5  ;;  %v328_v26 = vsub.f32 %v1123_v7, %v1120_v6 }
  0xd0   : > { %496 = vrot.lane.b32.xlu0 %v474_v27, %s908_s22  ;;  %494 = vrot.lane.b32.xlu1 %v473_v34, %s908_s22  ;;  %v406_v39 = vsub.f32 %v1112_v4, %v381_v35  ;;  %v407_v45 = vsub.f32 %v1115_v5, %v383_v40  ;;  %v274_v27 = vsub.f32 %v1128_v8, %v262_v25  ;;  %v305_v34 = vsel %vm289_vm0, %v285_v28, 0.0  ;;  %v1190_v35 = vld [vmem:[%s1083_s30 + $0x58] sm:$0x3f] }
  0xd1   : > { %v306_v37 = vadd.f32 %v305_v34, %v304_v31  ;;  %v415_v30 = vmul.f32 %v325_v18, %v325_v18  ;;  %v370_v34 = vsub.f32 %v1128_v8, %v350_v22 }
  0xd2   : > { %v476_v46 = vmul.f32 %v406_v39, %v406_v39  ;;  %v477_v50 = vmul.f32 %v407_v45, %v407_v45  ;;  %v286_v33 = vmul.f32 %v274_v27, %v274_v27  ;;  %v287_v39 = vmul.f32 %v275_v32, %v275_v32 }
  0xd3   : > { %v385_v47 = vpop.permute.xlu0 %384  ;;  %v387_v52 = vpop.permute.xlu1 %386  ;;  %v428_v27 = vmul.f32 %v368_v15, %v368_v15  ;;  %v416_v32 = vmul.f32 %v326_v20, %v326_v20 }
  0xd4   : > { %498 = vrot.lane.b32.xlu1 %v475_v38, %s908_s22  ;;  %v408_v51 = vsub.f32 %v1120_v6, %v385_v47  ;;  %500 = vrot.lane.b32.xlu0 %v476_v46, %s908_s22  ;;  %v409_v55 = vsub.f32 %v1123_v7, %v387_v52  ;;  %v276_v38 = vsub.f32 %v1190_v35, %v264_v36  ;;  %v307_v40 = vsel %vm289_vm0, %v286_v33, 0.0 }
  0xd5   : > { %v308_v42 = vadd.f32 %v307_v40, %v306_v37  ;;  %v309_v44 = vsel %vm289_vm0, %v287_v39, 0.0  ;;  %v363_v52 = vsub.f32 %v1104_v2, %v343_v49  ;;  %v349_v2 = vrot.slane %v1123_v7, 7 }
  0xd6   : > { %v478_v57 = vmul.f32 %v408_v51, %v408_v51  ;;  %v479_v61 = vmul.f32 %v409_v55, %v409_v55  ;;  %v288_v43 = vmul.f32 %v276_v38, %v276_v38  ;;  %v362_v51 = vsub.f32 %v1096_v0, %v342_v48 }
  0xd7   : > { %v389_v58 = vpop.permute.xlu0 %388  ;;  %v391_v63 = vpop.permute.xlu1 %390  ;;  %v310_v45 = vadd.f32 %v309_v44, %v308_v42  ;;  %v346_v55 = vrot.slane %v1112_v4, 7  ;;  %v369_v28 = vsub.f32 %v1123_v7, %v349_v2  ;;  %v329_v37 = vsub.f32 %v1128_v8, %v1123_v7 }
  0xd8   : > { %502 = vrot.lane.b32.xlu1 %v477_v50, %s908_s22  ;;  %v410_v62 = vsub.f32 %v1128_v8, %v389_v58  ;;  %504 = vrot.lane.b32.xlu0 %v478_v57, %s908_s22  ;;  %v411_v12 = vsub.f32 %v1131_v9, %v391_v63  ;;  %v311_v46 = vsel %vm289_vm0, %v288_v43, 0.0  ;;  %v344_v50 = vrot.slane %v1100_v1, 7 }
  0xd9   : > { %v312_v47 = vadd.f32 %v311_v46, %v310_v45  ;;  %v347_v57 = vrot.slane %v1115_v5, 7  ;;  %v422_v58 = vmul.f32 %v362_v51, %v362_v51  ;;  %v365_v63 = vsub.f32 %v1107_v3, %v345_v53 }
  0xda   : > { %v480_v14 = vmul.f32 %v410_v62, %v410_v62  ;;  %v481_v16 = vmul.f32 %v411_v12, %v411_v12  ;;  %v364_v54 = vsub.f32 %v1100_v1, %v344_v50  ;;  %v324_v62 = vsub.f32 %v1107_v3, %v1100_v1 }
  0xdb   : > { %v366_v11 = vsub.f32 %v1112_v4, %v346_v55  ;;  %v412_v12 = vmul.f32 %v322_v56, %v322_v56  ;;  %v367_v0 = vsub.f32 %v1115_v5, %v347_v57  ;;  %v442_v13 = vrot.slane %v422_v58, 1 }
  0xdc   : > { %506 = vrot.lane.b32.xlu1 %v479_v61, %s908_s22  ;;  %508 = vrot.lane.b32.xlu0 %v480_v14, %s908_s22  ;;  %v423_v61 = vmul.f32 %v363_v52, %v363_v52  ;;  %v424_v10 = vmul.f32 %v364_v54, %v364_v54  ;;  %v413_v14 = vmul.f32 %v323_v59, %v323_v59  ;;  %v351_v4 = vrot.slane %v1131_v9, 7 }
  0xdd   : > { %v414_v17 = vmul.f32 %v324_v62, %v324_v62  ;;  %v425_v1 = vmul.f32 %v365_v63, %v365_v63  ;;  %v426_v21 = vmul.f32 %v366_v11, %v366_v11  ;;  %v427_v24 = vmul.f32 %v367_v0, %v367_v0 }
  0xde   : > { %v444_v19 = vrot.slane %v424_v10, 1  ;;  %v462_v25 = vadd.f32 %v442_v13, %v412_v12  ;;  %v417_v5 = vmul.f32 %v327_v23, %v327_v23  ;;  %v418_v38 = vmul.f32 %v328_v26, %v328_v26 }
  0xdf   : > { %v445_v31 = vrot.slane %v425_v1, 1  ;;  %v446_v33 = vrot.slane %v426_v21, 1  ;;  %v447_v36 = vrot.slane %v427_v24, 1  ;;  %v448_v39 = vrot.slane %v428_v27, 1 }
  0xe0   : > { %510 = vrot.lane.b32.xlu1 %v481_v16, %s908_s22  ;;  %v443_v16 = vrot.slane %v423_v61, 1  ;;  %v464_v41 = vadd.f32 %v444_v19, %v414_v17  ;;  %v429_v40 = vmul.f32 %v369_v28, %v369_v28  ;;  %v330_v45 = vsub.f32 %v1131_v9, %v1128_v8 }
  0xe1   : > { %v465_v44 = vadd.f32 %v445_v31, %v415_v30  ;;  %v371_v46 = vsub.f32 %v1131_v9, %v351_v4  ;;  %v466_v49 = vadd.f32 %v446_v33, %v416_v32  ;;  %v430_v50 = vmul.f32 %v370_v34, %v370_v34 }
  0xe2   : > { %v463_v29 = vadd.f32 %v443_v16, %v413_v14  ;;  %v467_v51 = vadd.f32 %v447_v36, %v417_v5  ;;  %v419_v52 = vmul.f32 %v329_v37, %v329_v37  ;;  %v468_v54 = vadd.f32 %v448_v39, %v418_v38 }
  0xe3   : > { %v449_v55 = vrot.slane %v429_v40, 1  ;;  %v420_v59 = vmul.f32 %v330_v45, %v330_v45  ;;  %v331_v8 = vsub.f32 %v1190_v35, %v1131_v9  ;;  %v431_v60 = vmul.f32 %v371_v46, %v371_v46 }
  0xe4   : > { %v450_v10 = vrot.slane %v430_v50, 1 }
  0xe5   : > { %v469_v2 = vadd.f32 %v449_v55, %v419_v52  ;;  %v421_v16 = vmul.f32 %v331_v8, %v331_v8  ;;  %v451_v9 = vrot.slane %v431_v60, 1 }
  0xe6   : > { %v470_v1 = vadd.f32 %v450_v10, %v420_v59 }
  0xe7   : > { %v471_v26 = vadd.f32 %v451_v9, %v421_v16 }
  0xfb   : > { %313 = vadd.xlane.f32.xlu0 %v312_v47 }
 0x13e   : > { %v493_v3 = vpop.permute.xlu0 %492 }
 0x13f   : > { %v522_v6 = vadd.f32 %v493_v3, %v462_v25 }
 0x141   : > { %v533_v7 = vsel %vm532_vm1, %v522_v6, 0.0 }
 0x142   : > { %v495_v42 = vpop.permute.xlu1 %494  ;;  %v497_v43 = vpop.permute.xlu0 %496 }
 0x143   : > { %v523_v47 = vadd.f32 %v495_v42, %v463_v29  ;;  %v524_v48 = vadd.f32 %v497_v43, %v464_v41 }
 0x145   : > { %v534_v53 = vsel %vm532_vm1, %v523_v47, 0.0  ;;  %v536_v61 = vsel %vm532_vm1, %v524_v48, 0.0 }
 0x146   : > { %v535_v56 = vadd.f32 %v534_v53, %v533_v7  ;;  %v499_v57 = vpop.permute.xlu1 %498  ;;  %v501_v58 = vpop.permute.xlu0 %500 }
 0x147   : > { %v525_v62 = vadd.f32 %v499_v57, %v465_v44  ;;  %v526_v63 = vadd.f32 %v501_v58, %v466_v49 }
 0x148   : > { %v537_v11 = vadd.f32 %v536_v61, %v535_v56 }
 0x149   : > { %v538_v12 = vsel %vm532_vm1, %v525_v62, 0.0  ;;  %v540_v0 = vsel %vm532_vm1, %v526_v63, 0.0 }
 0x14a   : > { %v539_v13 = vadd.f32 %v538_v12, %v537_v11  ;;  %v503_v14 = vpop.permute.xlu1 %502  ;;  %v505_v15 = vpop.permute.xlu0 %504 }
 0x14b   : > { %v527_v17 = vadd.f32 %v503_v14, %v467_v51  ;;  %v528_v18 = vadd.f32 %v505_v15, %v468_v54 }
 0x14c   : > { %v541_v35 = vadd.f32 %v540_v0, %v539_v13 }
 0x14d   : > { %v542_v19 = vsel %vm532_vm1, %v527_v17, 0.0  ;;  %v544_v20 = vsel %vm532_vm1, %v528_v18, 0.0 }
 0x14e   : > { %v543_v21 = vadd.f32 %v542_v19, %v541_v35  ;;  %v507_v22 = vpop.permute.xlu1 %506  ;;  %v509_v23 = vpop.permute.xlu0 %508 }
 0x14f   : > { %v529_v24 = vadd.f32 %v507_v22, %v469_v2  ;;  %v530_v25 = vadd.f32 %v509_v23, %v470_v1 }
 0x150   : > { %v545_v27 = vadd.f32 %v544_v20, %v543_v21 }
 0x151   : > { %v546_v28 = vsel %vm532_vm1, %v529_v24, 0.0  ;;  %v548_v3 = vsel %vm532_vm1, %v530_v25, 0.0 }
 0x152   : > { %v547_v29 = vadd.f32 %v546_v28, %v545_v27  ;;  %v511_v30 = vpop.permute.xlu1 %510 }
 0x153   : > { %v531_v31 = vadd.f32 %v511_v30, %v471_v26 }
 0x154   : > { %v549_v4 = vadd.f32 %v548_v3, %v547_v29 }
 0x155   : > { %v550_v41 = vsel %vm532_vm1, %v531_v31, 0.0 }
 0x156   : > { %v551_v32 = vadd.f32 %v550_v41, %v549_v4 }
 0x158   : > { %552 = vadd.xlane.f32.xlu1 %v551_v32 }
 0x184   : > { %v314_v33 = vpop.xlane.xlu0 %313 }
 0x185   : > { %v315_v34 = vrot.slane %v314_v33, 4 }
 0x187   : > { %v316_v5 = vadd.f32 %v315_v34, %v314_v33 }
 0x189   : > { %v317_v36 = vrot.slane %v316_v5, 2 }
 0x18b   : > { %v318_v37 = vadd.f32 %v317_v36, %v316_v5 }
 0x18d   : > { %v319_v6 = vrot.slane %v318_v37, 1 }
 0x18f   : > { %v320_v38 = vadd.f32 %v319_v6, %v318_v37 }
 0x191   : > { %699 = vpush %v320_v38 }
 0x1c2   : > { %s700_s29 = spop %699 }
 0x1c3   : > { %s562_s6 = sadd.f32 %s700_s29, %s561_s28 }
 0x1c5   : > { %564 = sst [smem:[#allocation2]] %s562_s6  ;;  %s575_s24 = smul.f32 %s574_s8, %s562_s6 }
 0x1e1   : > { %v553_v39 = vpop.xlane.xlu1 %552 }
 0x1e2   : > { %v554_v40 = vrot.slane %v553_v39, 4 }
 0x1e4   : > { %v555_v42 = vadd.f32 %v554_v40, %v553_v39 }
 0x1e6   : > { %v556_v43 = vrot.slane %v555_v42, 2 }
 0x1e8   : > { %v557_v44 = vadd.f32 %v556_v43, %v555_v42 }
 0x1ea   : > { %v558_v45 = vrot.slane %v557_v44, 1 }
 0x1ec   : > { %v559_v46 = vadd.f32 %v558_v45, %v557_v44 }
 0x1ee   : > { %701 = vpush %v559_v46 }
 0x21f   : > { %s702_s9 = spop %701 }
 0x220   : > { %s566_s4 = sadd.f32 %s702_s9, %s686_s21 }
 0x222   : > { %568 = sst [smem:[#allocation2 + $0x1]] %s566_s4  ;;  %s578_s26 = smul.f32 %s689_s27, %s566_s4 }
 0x224   : > { %s579_s5 = sadd.f32 %s578_s26, %s575_s24 }
 0x226   : > { %715 = sst [smem:[#allocation10]] (%p735_p9), %s579_s5 }
 0x227   : > { %717 = dma.smem_to_hbm (%p735_p9), %s910_s11, 16, %s1272_s3, [#allocation6]  }
 0x228   : > { %883 = dma.done.wait (%p735_p9), [#allocation6], 16  }
 0x229   : > { %885 = vsyncadd (%p735_p9), [#allocation6], 4294967280 }
 0x22a   : > { %595 = sfence }
 0x22b PF: > { %p18_p12 = scmp.ge.s32.totalorder %s951_s17, 5   ;;  %s1282_s12 = smov %s892_s13 }
 0x22c   : > { %s1283_s13 = smov %s896_s14  ;;  %s1284_s14 = smov %s961_s20 }
 0x22d   : > { %s1285_s15 = smov %s951_s17  ;;  %20 = sbr.rel (!%p18_p12) target bundleno = 7 (0x7), region = 100 }
 0x232   :  { %601 = vsyncpa [#allocation4], 1 }
 0x233   :  { %603 = vsyncpa [#allocation4 + $0x1], 1 }
 0x234   :  { %604 = vsyncpa [#allocation9], 1 }
 0x235   :  { %606 = vsyncpa [#allocation9 + $0x1], 1 }
 0x236   :  { %607 = vsyncpa [#allocation5], 1 }
 0x237   :  { %609 = vsyncpa [#allocation5 + $0x1], 1 }
 0x238   :  { %610 = vsyncpa [#allocation6], 1 }
 0x239   :  { %612 = vsyncpa [#allocation6 + $0x1], 1 }

</bundles_post_ra>
